<compile_context>
chip_gen: v6e
topology: v6e:2x2x1
jax: 0.10.0
libtpu: 0.0.40
codegen_flags: <defaults>
</compile_context>

<pallas_src>
import functools

import jax
import jax.numpy as jnp
from jax.experimental import pallas as pl
from jax.experimental.pallas import tpu as pltpu


# ----------------------------- tiling helper -------------------------------

def _tile(dim, candidates):
    """Largest candidate tile that evenly divides `dim`; else the full dim."""
    for c in candidates:
        if dim >= c and dim % c == 0:
            return c
    return dim


# ---------------- tiled linear (+bias, +optional GELU), single K step -------

def _linear_bias_act_kernel(x_ref, w_ref, b_ref, o_ref, *, activation):
    # K is kept whole (every matmul here has K <= 512), so the dot feeds the
    # epilogue directly -- no f32 accumulator scratch, no pl.when phases.
    y = jnp.dot(x_ref[...], w_ref[...], preferred_element_type=jnp.float32)
    y = y + b_ref[...]
    if activation == "gelu":
        # TODO(synk): HF Longformer uses exact (erf) GELU; tanh approx here.
        y = 0.5 * y * (1.0 + jnp.tanh(
            0.7978845608028654 * (y + 0.044715 * y * y * y)))
    o_ref[...] = y.astype(o_ref.dtype)


def linear_bias_act(x, w, b, activation=None):
    """y = act(x @ w + b), bf16 in/out, f32 MXU accumulation, grid (M, N)."""
    M, K = x.shape
    N = w.shape[1]
    tm = _tile(M, (256, 128))
    tn = _tile(N, (256, 128))
    kernel = functools.partial(_linear_bias_act_kernel, activation=activation)
    return pl.pallas_call(
        kernel,
        out_shape=jax.ShapeDtypeStruct((M, N), jnp.bfloat16),
        grid=(M // tm, N // tn),
        in_specs=[
            pl.BlockSpec((tm, K), lambda i, j: (i, 0)),
            pl.BlockSpec((K, tn), lambda i, j: (0, j)),
            pl.BlockSpec((1, tn), lambda i, j: (0, j)),
        ],
        out_specs=pl.BlockSpec((tm, tn), lambda i, j: (i, j)),
        compiler_params=pltpu.CompilerParams(
            dimension_semantics=("parallel", "parallel")),
    )(x, w, b)


# ---------- linear + bias + residual + LayerNorm (+LeakyReLU), 1 K step -----

def _linear_add_ln_kernel(x_ref, w_ref, b_ref, res_ref, g_ref, bt_ref, o_ref,
                          *, eps, leaky_slope):
    y = jnp.dot(x_ref[...], w_ref[...], preferred_element_type=jnp.float32)
    y = y + b_ref[...] + res_ref[...].astype(jnp.float32)
    mean = jnp.mean(y, axis=-1, keepdims=True)
    var = jnp.mean(jnp.square(y - mean), axis=-1, keepdims=True)
    y = (y - mean) * jax.lax.rsqrt(var + eps)
    y = y * g_ref[...] + bt_ref[...]
    if leaky_slope is not None:
        y = jnp.where(y >= 0, y, leaky_slope * y)
    o_ref[...] = y.astype(o_ref.dtype)


def linear_add_ln(x, w, b, residual, gamma, beta, eps=1e-5, leaky_slope=None):
    """y = LN(x @ w + b + residual) [optionally followed by LeakyReLU].
    N (= hidden) is kept whole so LayerNorm sees full rows; K is a single
    step; only M is tiled (tm=256 -> 2 parallel blocks for v7x megacore,
    only 2 steps on single-core v5e/v6e)."""
    M, K = x.shape
    H = w.shape[1]
    tm = _tile(M, (256, 128))
    kernel = functools.partial(_linear_add_ln_kernel, eps=eps,
                               leaky_slope=leaky_slope)
    return pl.pallas_call(
        kernel,
        out_shape=jax.ShapeDtypeStruct((M, H), jnp.bfloat16),
        grid=(M // tm,),
        in_specs=[
            pl.BlockSpec((tm, K), lambda i: (i, 0)),
            pl.BlockSpec((K, H), lambda i: (0, 0)),
            pl.BlockSpec((1, H), lambda i: (0, 0)),
            pl.BlockSpec((tm, H), lambda i: (i, 0)),
            pl.BlockSpec((1, H), lambda i: (0, 0)),
            pl.BlockSpec((1, H), lambda i: (0, 0)),
        ],
        out_specs=pl.BlockSpec((tm, H), lambda i: (i, 0)),
        compiler_params=pltpu.CompilerParams(
            dimension_semantics=("parallel",)),
    )(x, w, b, residual, gamma, beta)


# ----------------------- standalone LayerNorm (embeddings) -----------------

def _layernorm_kernel(x_ref, g_ref, b_ref, o_ref, *, eps):
    x = x_ref[...].astype(jnp.float32)
    mean = jnp.mean(x, axis=-1, keepdims=True)
    var = jnp.mean(jnp.square(x - mean), axis=-1, keepdims=True)
    y = (x - mean) * jax.lax.rsqrt(var + eps)
    o_ref[...] = (y * g_ref[...] + b_ref[...]).astype(o_ref.dtype)


def layernorm(x2d, gamma, beta, eps=1e-5):
    M, H = x2d.shape
    tm = _tile(M, (256, 128))
    return pl.pallas_call(
        functools.partial(_layernorm_kernel, eps=eps),
        out_shape=jax.ShapeDtypeStruct((M, H), jnp.bfloat16),
        grid=(M // tm,),
        in_specs=[pl.BlockSpec((tm, H), lambda i: (i, 0)),
                  pl.BlockSpec((1, H), lambda i: (0, 0)),
                  pl.BlockSpec((1, H), lambda i: (0, 0))],
        out_specs=pl.BlockSpec((tm, H), lambda i: (i, 0)),
        compiler_params=pltpu.CompilerParams(dimension_semantics=("parallel",)),
    )(x2d, gamma, beta)


# ---------------- fused QKV projection + multi-head attention ---------------

def _qkv_attention_kernel(x_ref, w_ref, b_ref, bias_ref, o_ref,
                          *, num_heads, head_dim):
    """Per batch element: qkv = x @ w_qkv + b_qkv, then per-head single-pass
    softmax attention; context written back lane-dense as [S, H]."""
    hidden = num_heads * head_dim
    x = x_ref[0]                                              # [S, H] bf16
    qkv = jnp.dot(x, w_ref[...],
                  preferred_element_type=jnp.float32) + b_ref[...]  # [S, 3H]
    bias = bias_ref[0]                                        # [1, S] f32
    # TODO(synk): attention_probs_dropout_prob=0.2 is an eval-mode no-op.
    ctx_heads = []
    for h in range(num_heads):                                # unrolled, Hh=4
        lo = h * head_dim
        q = qkv[:, lo:lo + head_dim].astype(jnp.bfloat16)                 # [S, Dh]
        k = qkv[:, hidden + lo:hidden + lo + head_dim].astype(jnp.bfloat16)
        v = qkv[:, 2 * hidden + lo:2 * hidden + lo + head_dim].astype(jnp.bfloat16)
        # scale 1/sqrt(Dh) is pre-folded into the Q columns of w_qkv/b_qkv.
        s = jax.lax.dot_general(q, k, (((1,), (1,)), ((), ())),
                                preferred_element_type=jnp.float32)       # [S, S]
        s = s + bias
        m = jnp.max(s, axis=-1, keepdims=True)
        p = jnp.exp(s - m)
        l = jnp.sum(p, axis=-1, keepdims=True)   # >= 1, so reciprocal is safe
        ctx = jnp.dot(p.astype(jnp.bfloat16), v,
                      preferred_element_type=jnp.float32)                 # [S, Dh]
        ctx_heads.append(ctx * pl.reciprocal(l, approx=True))
    o_ref[0] = jnp.concatenate(ctx_heads, axis=-1).astype(o_ref.dtype)


def qkv_attention(x3, w_qkv, b_qkv, mask_bias, num_heads):
    """x3: [B, S, H] bf16; w_qkv: [H, 3H] bf16; b_qkv: [1, 3H] f32;
    mask_bias: [B, 1, S] f32 additive bias.  Returns context [B, S, H] bf16."""
    B, S, H = x3.shape
    Dh = H // num_heads
    # TODO(synk): for the real Clinical-Longformer config (H=768, S=4096) the
    # per-batch [S, S] f32 score tile would need q/kv tiling + online softmax
    # and an explicit vmem_limit_bytes; at S=256 a single pass is cheapest.
    kernel = functools.partial(_qkv_attention_kernel,
                               num_heads=num_heads, head_dim=Dh)
    return pl.pallas_call(
        kernel,
        out_shape=jax.ShapeDtypeStruct((B, S, H), jnp.bfloat16),
        grid=(B,),
        in_specs=[
            pl.BlockSpec((1, S, H), lambda b: (b, 0, 0)),
            pl.BlockSpec((H, 3 * H), lambda b: (0, 0)),
            pl.BlockSpec((1, 3 * H), lambda b: (0, 0)),
            pl.BlockSpec((1, 1, S), lambda b: (b, 0, 0)),
        ],
        out_specs=pl.BlockSpec((1, S, H), lambda b: (b, 0, 0)),
        compiler_params=pltpu.CompilerParams(
            dimension_semantics=("parallel",)),
    )(x3, w_qkv, b_qkv, mask_bias)


# ------------------------------ model wrapper -------------------------------

CFG = dict(vocab=100, max_pos=256, hidden=128, heads=4, ffn=512, layers=2)


def init_params(key, cfg):
    h, f = cfg["hidden"], cfg["ffn"]
    dh = h // cfg["heads"]
    attn_scale = 1.0 / (dh ** 0.5)

    def norm(k, shape, scale=0.02):
        return scale * jax.random.normal(k, shape, dtype=jnp.float32)

    keys = iter(jax.random.split(key, 128))
    params = {
        "word_emb": norm(next(keys), (cfg["vocab"], h)),
        "pos_emb": norm(next(keys), (cfg["max_pos"], h)),
        "emb_ln_g": 1.0 + norm(next(keys), (1, h)),
        "emb_ln_b": norm(next(keys), (1, h)),
        "layers": [],
    }
    for _ in range(cfg["layers"]):
        w_qkv = norm(next(keys), (h, 3 * h))
        b_qkv = norm(next(keys), (1, 3 * h))
        # Fold the 1/sqrt(Dh) attention scale into the Q projection so the
        # kernel never multiplies the [S, S] score tile.
        w_qkv = w_qkv.at[:, :h].multiply(attn_scale)
        b_qkv = b_qkv.at[:, :h].multiply(attn_scale)
        layer = {
            "w_qkv": w_qkv.astype(jnp.bfloat16),     # [H, 3H], cols: q | k | v
            "b_qkv": b_qkv,                           # [1, 3H] f32
            "wo": norm(next(keys), (h, h)).astype(jnp.bfloat16),
            "bo": norm(next(keys), (1, h)),
            "ln1_g": 1.0 + norm(next(keys), (1, h)),
            "ln1_b": norm(next(keys), (1, h)),
            "w1": norm(next(keys), (h, f)).astype(jnp.bfloat16),
            "b1": norm(next(keys), (1, f)),
            "w2": norm(next(keys), (f, h)).astype(jnp.bfloat16),
            "b2": norm(next(keys), (1, h)),
            "ln2_g": 1.0 + norm(next(keys), (1, h)),
            "ln2_b": norm(next(keys), (1, h)),
        }
        params["layers"].append(layer)
    return params


def text_model_forward(params, input_ids, attention_mask, cfg=CFG):
    B, S = input_ids.shape
    H, Hh = cfg["hidden"], cfg["heads"]
    M = B * S
    n_layers = len(params["layers"])

    # --- embeddings (gather is glue; LayerNorm runs in Pallas) ---
    word = params["word_emb"][input_ids]                   # [B, S, H]
    pos = params["pos_emb"][:S][None, :, :]                # [1, S, H]
    emb = (word + pos).reshape(M, H)
    x = layernorm(emb, params["emb_ln_g"], params["emb_ln_b"])   # bf16 [M, H]
    # TODO(synk): embedding / hidden dropout (p=0.2) are eval-mode no-ops.

    # additive attention-mask bias: 0 where attended, -1e9 where masked
    mask_bias = ((1.0 - attention_mask.astype(jnp.float32)) * -1e9
                 ).reshape(B, 1, S)

    for li, layer in enumerate(params["layers"]):
        # --- fused QKV projection + multi-head attention (lane-dense I/O) ---
        ctx = qkv_attention(x.reshape(B, S, H), layer["w_qkv"], layer["b_qkv"],
                            mask_bias, num_heads=Hh).reshape(M, H)

        # --- output projection fused with residual-add + LayerNorm ---
        x = linear_add_ln(ctx, layer["wo"], layer["bo"], x,
                          layer["ln1_g"], layer["ln1_b"])

        # --- feed-forward: up-proj + GELU, down-proj fused with add + LN ---
        inter = linear_bias_act(x, layer["w1"], layer["b1"], activation="gelu")
        is_last = (li == n_layers - 1)
        # final TextModel LeakyReLU is fused into the last layer's LN epilogue
        x = linear_add_ln(inter, layer["w2"], layer["b2"], x,
                          layer["ln2_g"], layer["ln2_b"],
                          leaky_slope=0.01 if is_last else None)

    # TODO(synk): nn.Dropout(0.2) after LeakyReLU is identity in eval mode.
    return x.reshape(B, S, H).astype(jnp.float32)


# ------------------------- pure-JAX reference (f32) -------------------------

def reference_forward(params, input_ids, attention_mask, cfg=CFG):
    B, S = input_ids.shape
    H, Hh = cfg["hidden"], cfg["heads"]
    Dh = H // Hh
    f32 = lambda t: t.astype(jnp.float32)

    def ln(x, g, b, eps=1e-5):
        mu = jnp.mean(x, -1, keepdims=True)
        var = jnp.mean((x - mu) ** 2, -1, keepdims=True)
        return (x - mu) * jax.lax.rsqrt(var + eps) * g + b

    def gelu(x):
        return 0.5 * x * (1.0 + jnp.tanh(
            0.7978845608028654 * (x + 0.044715 * x ** 3)))

    word = params["word_emb"][input_ids]
    pos = params["pos_emb"][:S][None]
    x = ln(word + pos, params["emb_ln_g"], params["emb_ln_b"])     # [B, S, H]
    bias = (1.0 - attention_mask.astype(jnp.float32)) * -1e9       # [B, S]

    for layer in params["layers"]:
        # note: 1/sqrt(Dh) is already folded into the Q columns of w_qkv/b_qkv
        qkv = x @ f32(layer["w_qkv"]) + layer["b_qkv"]
        qkv = qkv.reshape(B, S, 3, Hh, Dh).transpose(2, 0, 3, 1, 4)
        q, k, v = qkv[0], qkv[1], qkv[2]
        s = jnp.einsum("bhqd,bhkd->bhqk", q, k) + bias[:, None, None, :]
        p = jax.nn.softmax(s, axis=-1)
        ctx = jnp.einsum("bhqk,bhkd->bhqd", p, v)
        ctx = ctx.transpose(0, 2, 1, 3).reshape(B, S, H)
        x = ln(ctx @ f32(layer["wo"]) + layer["bo"] + x,
               layer["ln1_g"], layer["ln1_b"])
        inter = gelu(x @ f32(layer["w1"]) + layer["b1"])
        x = ln(inter @ f32(layer["w2"]) + layer["b2"] + x,
               layer["ln2_g"], layer["ln2_b"])
    return jnp.where(x >= 0, x, 0.01 * x)


# ---------------------------------- main -------------------------------------

if __name__ == "__main__":
    B, S = 2, 256
    key = jax.random.PRNGKey(0)
    k_param, k_ids = jax.random.split(key)

    params = init_params(k_param, CFG)
    input_ids = jax.random.randint(k_ids, (B, S), 0, CFG["vocab"], dtype=jnp.int32)
    attention_mask = jnp.ones((B, S), dtype=jnp.int32).at[1, S - 64:].set(0)

    out = text_model_forward(params, input_ids, attention_mask)
    out = jax.block_until_ready(out)

    assert out.shape == (B, S, CFG["hidden"])
    assert bool(jnp.all(jnp.isfinite(out)))

    ref = reference_forward(params, input_ids, attention_mask)
    max_diff = float(jnp.max(jnp.abs(out - ref.astype(jnp.float32))))
    assert max_diff < 0.15, f"mismatch vs reference: max diff {max_diff}"

    print("KERNEL_OK")
</pallas_src>

<mosaic_0001>
module attributes {stable_mosaic.version = 11 : i64} {
  func.func @_layernorm_kernel(%arg0: i32, %arg1: memref<256x128xf32, #tpu.memory_space<vmem>>, %arg2: memref<1x128xf32, #tpu.memory_space<vmem>>, %arg3: memref<1x128xf32, #tpu.memory_space<vmem>>, %arg4: memref<256x128xbf16, #tpu.memory_space<vmem>>) attributes {dimension_semantics = [#tpu.dimension_semantics<parallel>], iteration_bounds = array<i64: 2>, scalar_prefetch = 0 : i64, scratch_operands = 0 : i64, tpu.core_type = #tpu.core_type<tc>, window_params = [{transform_indices = @transform_0, window_bounds = array<i64: 256, 128>}, {pipeline_mode = #tpu.pipeline_mode<synchronous>, transform_indices = @transform_1, window_bounds = array<i64: 1, 128>}, {pipeline_mode = #tpu.pipeline_mode<synchronous>, transform_indices = @transform_2, window_bounds = array<i64: 1, 128>}, {transform_indices = @transform_3, window_bounds = array<i64: 256, 128>}]} {
    %c0 = arith.constant 0 : index
    %c0_0 = arith.constant 0 : index
    %0 = vector.load %arg1[%c0, %c0_0] : memref<256x128xf32, #tpu.memory_space<vmem>>, vector<256x128xf32>
    %cst = arith.constant dense<0.000000e+00> : vector<256xf32>
    %1 = vector.multi_reduction <add>, %0, %cst [1] : vector<256x128xf32> to vector<256xf32>
    %2 = vector.shape_cast %1 : vector<256xf32> to vector<256x1xf32>
    %cst_1 = arith.constant 1.280000e+02 : f32
    %3 = vector.broadcast %cst_1 : f32 to vector<256x1xf32>
    %4 = arith.divf %2, %3 : vector<256x1xf32>
    %5 = vector.broadcast %4 : vector<256x1xf32> to vector<256x128xf32>
    %6 = arith.subf %0, %5 : vector<256x128xf32>
    %7 = arith.mulf %6, %6 : vector<256x128xf32>
    %cst_2 = arith.constant dense<0.000000e+00> : vector<256xf32>
    %8 = vector.multi_reduction <add>, %7, %cst_2 [1] : vector<256x128xf32> to vector<256xf32>
    %9 = vector.shape_cast %8 : vector<256xf32> to vector<256x1xf32>
    %cst_3 = arith.constant 1.280000e+02 : f32
    %10 = vector.broadcast %cst_3 : f32 to vector<256x1xf32>
    %11 = arith.divf %9, %10 : vector<256x1xf32>
    %12 = vector.broadcast %4 : vector<256x1xf32> to vector<256x128xf32>
    %13 = arith.subf %0, %12 : vector<256x128xf32>
    %cst_4 = arith.constant 9.99999974E-6 : f32
    %14 = vector.broadcast %cst_4 : f32 to vector<256x1xf32>
    %15 = arith.addf %11, %14 : vector<256x1xf32>
    %16 = math.rsqrt %15 : vector<256x1xf32>
    %17 = vector.broadcast %16 : vector<256x1xf32> to vector<256x128xf32>
    %18 = arith.mulf %13, %17 : vector<256x128xf32>
    %c0_5 = arith.constant 0 : index
    %c0_6 = arith.constant 0 : index
    %19 = vector.load %arg2[%c0_5, %c0_6] : memref<1x128xf32, #tpu.memory_space<vmem>>, vector<1x128xf32>
    %20 = vector.broadcast %19 : vector<1x128xf32> to vector<256x128xf32>
    %21 = arith.mulf %18, %20 : vector<256x128xf32>
    %c0_7 = arith.constant 0 : index
    %c0_8 = arith.constant 0 : index
    %22 = vector.load %arg3[%c0_7, %c0_8] : memref<1x128xf32, #tpu.memory_space<vmem>>, vector<1x128xf32>
    %23 = vector.broadcast %22 : vector<1x128xf32> to vector<256x128xf32>
    %24 = arith.addf %21, %23 : vector<256x128xf32>
    %25 = arith.truncf %24 : vector<256x128xf32> to vector<256x128xbf16>
    %c0_9 = arith.constant 0 : index
    %c0_10 = arith.constant 0 : index
    %26 = vector.load %arg4[%c0_9, %c0_10] : memref<256x128xbf16, #tpu.memory_space<vmem>>, vector<256x128xbf16>
    tpu.vector_store %arg4[%c0_9, %c0_10], %25 {strides = array<i32>} : memref<256x128xbf16, #tpu.memory_space<vmem>>, vector<256x128xbf16>,
    return
  }
  func.func @transform_0(%arg0: i32) -> (i32, i32) {
    %c0_i32 = arith.constant 0 : i32
    %c0_i32_0 = arith.constant 0 : i32
    return %arg0, %c0_i32 : i32, i32
  }
  func.func @transform_1(%arg0: i32) -> (i32, i32) {
    %c0_i32 = arith.constant 0 : i32
    %c0_i32_0 = arith.constant 0 : i32
    %c0_i32_1 = arith.constant 0 : i32
    return %c0_i32, %c0_i32_0 : i32, i32
  }
  func.func @transform_2(%arg0: i32) -> (i32, i32) {
    %c0_i32 = arith.constant 0 : i32
    %c0_i32_0 = arith.constant 0 : i32
    %c0_i32_1 = arith.constant 0 : i32
    return %c0_i32, %c0_i32_0 : i32, i32
  }
  func.func @transform_3(%arg0: i32) -> (i32, i32) {
    %c0_i32 = arith.constant 0 : i32
    %c0_i32_0 = arith.constant 0 : i32
    return %arg0, %c0_i32 : i32, i32
  }
}

</mosaic_0001>

<bundles_post_ra>
// kernel: tpu_custom_call.1
= control target key start
LH: loop header
LB: loop body
LE: loop exit
PB: predicated region body
PF: predicated region fallthrough
CT: control target
= control target key end

     0   :  { %8 = vsyncpa [#allocation3], 0  ;;  %s1882_s0 = inlined_call_operand.hbm [shape: f32[512,128], index: 0, kind: input, shape index: {}]   ;;  %s1883_s1 = inlined_call_operand.vmem [shape: f32[1,128], index: 1, kind: input, shape index: {}]   ;;  %s1884_s2 = inlined_call_operand.vmem [shape: f32[1,128], index: 2, kind: input, shape index: {}]   ;;  %s1885_s3 = inlined_call_operand.hbm [shape: bf16[512,128], index: 3, kind: output, shape index: {}]  }
   0x1   :  { %10 = vsyncpa [#allocation3 + $0x1], 0 }
   0x2   :  { %11 = vsyncpa [#allocation4], 0 }
   0x3   :  { %13 = vsyncpa [#allocation4 + $0x1], 0  ;;  %s1312_s12 = smov 0   ;;  %s1314_s13 = smov 0  }
   0x4   :  { %s1316_s14 = smov 0   ;;  %s1318_s15 = smov 0  }
   0x5 LB: > { %s1333_s16 = sadd.s32 4294967295, %s1284_s15   ;;  %s901_s17 = sadd.s32 4294967294, %s1284_s15   ;;  %s1284_s15 = sphi %s1318_s15, %s1900_s15   ;;  %s1280_s14 = sphi %s1316_s14, %s1899_s14   ;;  %s1276_s13 = sphi %s1314_s13, %s1898_s13   ;;  %s1272_s12 = sphi %s1312_s12, %s1897_s12  }
   0x6   : > { %s1337_s18 = sadd.s32 1, %s1284_s15   ;;  %s26_s19 = sadd.s32 1, %s1280_s14 }
   0x7   : > { %s23_s20 = ssub.s32 %s1284_s15, %s1337_s18  ;;  %p33_p0 = scmp.ne.s32.totalorder %s1280_s14, %s1276_s13 }
   0x8   : > { %p24_p1 = scmp.eq.s32.totalorder %s23_s20, 0  ;;  %p34_p2 = scmp.eq.s32.totalorder %s1284_s15, 0 }
   0x9   : > { %p39_p3 = scmp.ne.s32.totalorder %s1276_s13, %s1272_s12  ;;  %p40_p4 = scmp.eq.s32.totalorder %s1333_s16, 0 }
   0xa   : > { %s1349_s21 = scalar_select %p24_p1, %s1280_s14, %s26_s19  }
   0xb   : > { %p1351_p5 = por %p34_p2, %p33_p0  ;;  %p1355_p6 = por %p40_p4, %p39_p3 }
   0xc   : > { %p105_p7 = scmp.eq.s32.totalorder %s1333_s16, 1  ;;  %p111_p8 = scmp.eq.s32.totalorder %s901_s17, 1 }
   0xd   : > { %s1889_s23 = scalar_select %p1355_p6, 1, 0 }
   0xe   : > { %p1090_p10 = scmp.lt.s32.totalorder %s1284_s15, 2  ;;  %p1362_p11 = por %p105_p7, %p33_p0 }
   0xf   : > { %p1366_p12 = por %p111_p8, %p39_p3  ;;  %s137_s26 = sand.u32 1, %s1280_s14  }
  0x10   : > { %s1890_s24 = scalar_select %p1362_p11, 1, 0 }
  0x11   : > { %s1891_s25 = scalar_select %p1366_p12, 1, 0 }
  0x12   : > { %s949_s27 = sshll.u32 %s1284_s15, 12  ;;  %s904_s28 = sshll.u32 %s137_s26, 8 }
  0x13   : > { %s1375_s4 = scalar_lea.hbm %s1882_s0, %s949_s27  ;;  %s141_s5 = scalar_lea.vmem [#allocation2], %s904_s28 }
  0x14   : > { %s148_s6 = sshll.u32 %s141_s5, 4  ;;  %p1379_p13 = pnand %p1090_p10, %p1351_p5  ;;  %s1383_s6 = int_to_ptr.vmem [resolvable:$true] %s148_s6 }
  0x15   : > { %s1385_s8 = scalar_lea.sflag [#allocation3], %s137_s26  ;;  %s1192_s9 = scalar_lea.hbm %s1375_s4, 4096 }
  0x16   : > { %p1193_p0 = scmp.ne.s32.totalorder %s1375_s4, %s1192_s9  ;;  %p1194_p1 = pneg %p1379_p13 }
  0x17   : > { %s1197_s17 = scalar_lea.hbm %s1882_s0, 8192  ;;  %p1198_p4 = scmp.lt.s32.totalorder %s1375_s4, %s1882_s0 }
  0x18   : > { %p1195_p2 = pnand %p1194_p1, %p1193_p0  ;;  %p1199_p5 = scmp.lt.s32.totalorder %s1197_s17, %s1192_s9 }
  0x1a   : > { %p1196_p3 = pneg %p1195_p2  ;;  %p1200_p7 = por %p1199_p5, %p1198_p4 }
  0x1c   : > { %p1201_p8 = pnand %p1200_p7, %p1196_p3 }
  0x1e   : > { %1204 = shalt.err (!%p1201_p8)
}
  0x1f   : > { %s1205_s22 = scalar_lea.vmem %s1383_s6, 4096  ;;  %s1286_s26 = smov [#allocation2]  }
  0x20   : > { %p1206_p10 = scmp.ne.s32.totalorder %s1383_s6, %s1205_s22  ;;  %s1210_s27 = sshll.u32 %s1286_s26, 4  ;;  %s1211_s27 = int_to_ptr.vmem [resolvable:$false] %s1210_s27 }
  0x21   : > { %s1212_s28 = scalar_lea.vmem %s1211_s27, 8192  ;;  %p1213_p2 = scmp.lt.s32.totalorder %s1383_s6, %s1211_s27 }
  0x22   : > { %p1208_p9 = pnand %p1206_p10, %p1194_p1  ;;  %p1214_p12 = scmp.lt.s32.totalorder %s1212_s28, %s1205_s22 }
  0x24   : > { %p1209_p0 = pneg %p1208_p9  ;;  %p1215_p11 = por %p1214_p12, %p1213_p2 }
  0x26   : > { %p1216_p6 = pnand %p1215_p11, %p1209_p0 }
  0x28   : > { %1219 = shalt.err (!%p1216_p6)
}
  0x29   : > { %s1287_s29 = smov 128   ;;  %s1288_s30 = smov 8  }
  0x2a   : > { %1085 = dma.hbm_to_vmem [thread:$0]  (!%p1379_p13), %s1375_s4, 4096, %s1383_s6, %s1385_s8, %s1287_s29, %s1287_s29, %s1288_s30  }
  0x2b   : > { %p907_p9 = scmp.ge.s32.totalorder %s1284_s15, 1  ;;  %p156_p1 = scmp.lt.s32.totalorder %s1284_s15, 3 }
  0x2d   : > { %p157_p3 = pnand %p907_p9, %p156_p1 }
  0x2e   : > { %s1409_s5 = sand.u32 (!%p157_p3), 1, %s1276_s13   ;;  %p1893_p6 = scmp.ne.s32.totalorder (!%p157_p3), %s1889_s23, 0 }
  0x2f   : > { %160 = sbr.rel (%p157_p3) target bundleno = 440 (0x1b8), region = 32  ;;  %s908_s9 = sshll.u32 (!%p157_p3), %s1409_s5, 8 }
  0x30   : > { %s163_s10 = scalar_lea.sflag (!%p157_p3), [#allocation3], %s1409_s5  ;;  %s1413_s11 = scalar_lea.vmem (!%p157_p3), [#allocation2], %s908_s9 }
  0x34   : > { %1263 = dma.done.wait (%p1893_p6), %s163_s10, 4096  }
  0x35   : > { %1265 = vsyncadd (%p1893_p6), %s163_s10, 4294963200  ;;  %v1420_v0 = vld [vmem:[%s1413_s11] sm:$0xff]  ;;  %v1423_v1 = vld [vmem:[%s1413_s11 + $0x10] sm:$0xff]  ;;  %s909_s8 = sshll.u32 %s1409_s5, 7  ;;  %s982_s19 = sshll.u32 %s1333_s16, 11 }
  0x36   : > { %223 = vadd.xlane.f32.xlu0 %v1420_v0  ;;  %227 = vadd.xlane.f32.xlu1 %v1423_v1  ;;  %v1428_v2 = vld [vmem:[%s1413_s11 + $0x8] sm:$0xff]  ;;  %v1431_v3 = vld [vmem:[%s1413_s11 + $0x18] sm:$0xff]  ;;  %v1436_v4 = vld [vmem:[%s1413_s11 + $0x20] sm:$0xff]  ;;  %s1730_s17 = scalar_lea.vmem [#allocation5], %s909_s8  ;;  %s1836_s27 = scalar_lea.hbm %s1885_s3, %s982_s19 }
  0x37   : > { %v1439_v5 = vld [vmem:[%s1413_s11 + $0x28] sm:$0xff]  ;;  %v1444_v6 = vld [vmem:[%s1413_s11 + $0x30] sm:$0xff]  ;;  %v1447_v7 = vld [vmem:[%s1413_s11 + $0x38] sm:$0xff]  ;;  %s828_s20 = sshll.u32 %s1730_s17, 4  ;;  %s815_s28 = scalar_lea.sflag [#allocation4], %s1409_s5  ;;  %s1838_s20 = int_to_ptr.vmem [resolvable:$true] %s828_s20 }
  0x38   : > { %v1452_v8 = vld [vmem:[%s1413_s11 + $0x40] sm:$0xff]  ;;  %v1455_v9 = vld [vmem:[%s1413_s11 + $0x48] sm:$0xff]  ;;  %v1460_v10 = vld [vmem:[%s1413_s11 + $0x50] sm:$0xff]  ;;  %s1220_s16 = scalar_lea.vmem %s1838_s20, 2048  ;;  %p1894_p12 = scmp.ne.s32.totalorder %s1890_s24, 0 }
  0x39   : > { %v1463_v11 = vld [vmem:[%s1413_s11 + $0x58] sm:$0xff]  ;;  %v1468_v12 = vld [vmem:[%s1413_s11 + $0x60] sm:$0xff]  ;;  %v1471_v13 = vld [vmem:[%s1413_s11 + $0x68] sm:$0xff]  ;;  %p1221_p11 = scmp.ne.s32.totalorder %s1838_s20, %s1220_s16  ;;  %s1289_s29 = smov [#allocation5]  }
  0x3a   : > { %225 = vadd.xlane.f32.xlu0 %v1428_v2  ;;  %229 = vadd.xlane.f32.xlu1 %v1431_v3  ;;  %v1476_v14 = vld [vmem:[%s1413_s11 + $0x70] sm:$0xff]  ;;  %v1479_v15 = vld [vmem:[%s1413_s11 + $0x78] sm:$0xff]  ;;  %v1484_v16 = vld [vmem:[%s1413_s11 + $0x80] sm:$0xff]  ;;  %s1224_s30 = sshll.u32 %s1289_s29, 4  ;;  %s1225_s30 = int_to_ptr.vmem [resolvable:$false] %s1224_s30 }
  0x3b   : > { %v1487_v17 = vld [vmem:[%s1413_s11 + $0x88] sm:$0xff]  ;;  %v1492_v18 = vld [vmem:[%s1413_s11 + $0x90] sm:$0xff]  ;;  %v1495_v19 = vld [vmem:[%s1413_s11 + $0x98] sm:$0xff]  ;;  %p1222_p13 = pnand %p1221_p11, %p1894_p12  ;;  %s1226_s9 = scalar_lea.vmem %s1225_s30, 4096 }
  0x3c   : > { %v1500_v20 = vld [vmem:[%s1413_s11 + $0xa0] sm:$0xff]  ;;  %v1503_v21 = vld [vmem:[%s1413_s11 + $0xa8] sm:$0xff]  ;;  %v1508_v22 = vld [vmem:[%s1413_s11 + $0xb0] sm:$0xff]  ;;  %p1227_p5 = scmp.lt.s32.totalorder %s1838_s20, %s1225_s30  ;;  %p1228_p7 = scmp.lt.s32.totalorder %s1226_s9, %s1220_s16 }
  0x3d   : > { %v1511_v23 = vld [vmem:[%s1413_s11 + $0xb8] sm:$0xff]  ;;  %v1516_v24 = vld [vmem:[%s1413_s11 + $0xc0] sm:$0xff]  ;;  %v1519_v25 = vld [vmem:[%s1413_s11 + $0xc8] sm:$0xff]  ;;  %p1223_p4 = pneg %p1222_p13 }
  0x3e   : > { %231 = vadd.xlane.f32.xlu0 %v1436_v4  ;;  %233 = vadd.xlane.f32.xlu1 %v1439_v5  ;;  %v1524_v26 = vld [vmem:[%s1413_s11 + $0xd0] sm:$0xff]  ;;  %v1527_v27 = vld [vmem:[%s1413_s11 + $0xd8] sm:$0xff]  ;;  %v1532_v28 = vld [vmem:[%s1413_s11 + $0xe0] sm:$0xff]  ;;  %p1229_p8 = por %p1228_p7, %p1227_p5 }
  0x3f   : > { %v1535_v29 = vld [vmem:[%s1413_s11 + $0xe8] sm:$0xff]  ;;  %v1540_v30 = vld [vmem:[%s1413_s11 + $0xf0] sm:$0xff]  ;;  %v1543_v31 = vld [vmem:[%s1413_s11 + $0xf8] sm:$0xff] }
  0x40   : > { %p1230_p10 = pnand %p1229_p8, %p1223_p4 }
  0x42   : > { %235 = vadd.xlane.f32.xlu0 %v1444_v6  ;;  %237 = vadd.xlane.f32.xlu1 %v1447_v7 }
  0x46   : > { %239 = vadd.xlane.f32.xlu0 %v1452_v8  ;;  %241 = vadd.xlane.f32.xlu1 %v1455_v9 }
  0x4a   : > { %243 = vadd.xlane.f32.xlu0 %v1460_v10  ;;  %245 = vadd.xlane.f32.xlu1 %v1463_v11 }
  0x4e   : > { %247 = vadd.xlane.f32.xlu0 %v1468_v12  ;;  %249 = vadd.xlane.f32.xlu1 %v1471_v13 }
  0x52   : > { %251 = vadd.xlane.f32.xlu0 %v1476_v14  ;;  %253 = vadd.xlane.f32.xlu1 %v1479_v15 }
  0x56   : > { %255 = vadd.xlane.f32.xlu0 %v1484_v16  ;;  %257 = vadd.xlane.f32.xlu1 %v1487_v17 }
  0x5a   : > { %259 = vadd.xlane.f32.xlu0 %v1492_v18  ;;  %261 = vadd.xlane.f32.xlu1 %v1495_v19 }
  0x5e   : > { %263 = vadd.xlane.f32.xlu0 %v1500_v20  ;;  %265 = vadd.xlane.f32.xlu1 %v1503_v21 }
  0x62   : > { %267 = vadd.xlane.f32.xlu0 %v1508_v22  ;;  %269 = vadd.xlane.f32.xlu1 %v1511_v23 }
  0x66   : > { %271 = vadd.xlane.f32.xlu0 %v1516_v24  ;;  %273 = vadd.xlane.f32.xlu1 %v1519_v25 }
  0x6a   : > { %275 = vadd.xlane.f32.xlu0 %v1524_v26  ;;  %277 = vadd.xlane.f32.xlu1 %v1527_v27 }
  0x6e   : > { %279 = vadd.xlane.f32.xlu0 %v1532_v28  ;;  %281 = vadd.xlane.f32.xlu1 %v1535_v29 }
  0x72   : > { %283 = vadd.xlane.f32.xlu0 %v1540_v30  ;;  %285 = vadd.xlane.f32.xlu1 %v1543_v31 }
  0xbf   : > { %v224_v32 = vpop.xlane.xlu0 %223  ;;  %v228_v33 = vpop.xlane.xlu1 %227 }
  0xc0   : > { %v288_v34 = vmul.f32 0.0078125, %v224_v32  ;;  %v290_v35 = vmul.f32 0.0078125, %v228_v33 }
  0xc2   : > { %v1548_v36 = vsub.f32 %v1420_v0, %v288_v34  ;;  %v1551_v37 = vsub.f32 %v1423_v1, %v290_v35 }
  0xc3   : > { %v226_v38 = vpop.xlane.xlu0 %225  ;;  %v230_v39 = vpop.xlane.xlu1 %229 }
  0xc4   : > { %v289_v40 = vmul.f32 0.0078125, %v226_v38  ;;  %v352_v41 = vmul.f32 %v1548_v36, %v1548_v36  ;;  %v291_v42 = vmul.f32 0.0078125, %v230_v39  ;;  %v354_v45 = vmul.f32 %v1551_v37, %v1551_v37 }
  0xc6   : > { %v1556_v43 = vsub.f32 %v1428_v2, %v289_v40  ;;  %384 = vadd.xlane.f32.xlu0 %v352_v41  ;;  %v1559_v44 = vsub.f32 %v1431_v3, %v291_v42 }
  0xc7   : > { %v232_v46 = vpop.xlane.xlu0 %231  ;;  %v234_v47 = vpop.xlane.xlu1 %233 }
  0xc8   : > { %v292_v48 = vmul.f32 0.0078125, %v232_v46  ;;  %v353_v49 = vmul.f32 %v1556_v43, %v1556_v43  ;;  %v293_v50 = vmul.f32 0.0078125, %v234_v47  ;;  %v355_v53 = vmul.f32 %v1559_v44, %v1559_v44 }
  0xca   : > { %v1566_v51 = vsub.f32 %v1436_v4, %v292_v48  ;;  %388 = vadd.xlane.f32.xlu0 %v354_v45  ;;  %386 = vadd.xlane.f32.xlu1 %v353_v49  ;;  %v1569_v52 = vsub.f32 %v1439_v5, %v293_v50 }
  0xcb   : > { %v236_v54 = vpop.xlane.xlu0 %235  ;;  %v238_v55 = vpop.xlane.xlu1 %237 }
  0xcc   : > { %v294_v56 = vmul.f32 0.0078125, %v236_v54  ;;  %v356_v57 = vmul.f32 %v1566_v51, %v1566_v51  ;;  %v295_v58 = vmul.f32 0.0078125, %v238_v55  ;;  %v357_v61 = vmul.f32 %v1569_v52, %v1569_v52 }
  0xce   : > { %v1576_v59 = vsub.f32 %v1444_v6, %v294_v56  ;;  %390 = vadd.xlane.f32.xlu1 %v355_v53  ;;  %392 = vadd.xlane.f32.xlu0 %v356_v57  ;;  %v1579_v60 = vsub.f32 %v1447_v7, %v295_v58 }
  0xcf   : > { %v240_v62 = vpop.xlane.xlu0 %239  ;;  %v242_v63 = vpop.xlane.xlu1 %241 }
  0xd0   : > { %v296_v0 = vmul.f32 0.0078125, %v240_v62  ;;  %v358_v1 = vmul.f32 %v1576_v59, %v1576_v59  ;;  %v297_v2 = vmul.f32 0.0078125, %v242_v63  ;;  %v359_v5 = vmul.f32 %v1579_v60, %v1579_v60 }
  0xd2   : > { %v1586_v3 = vsub.f32 %v1452_v8, %v296_v0  ;;  %394 = vadd.xlane.f32.xlu1 %v357_v61  ;;  %396 = vadd.xlane.f32.xlu0 %v358_v1  ;;  %v1589_v4 = vsub.f32 %v1455_v9, %v297_v2 }
  0xd3   : > { %v244_v6 = vpop.xlane.xlu0 %243  ;;  %v246_v7 = vpop.xlane.xlu1 %245 }
  0xd4   : > { %v298_v32 = vmul.f32 0.0078125, %v244_v6  ;;  %v360_v33 = vmul.f32 %v1586_v3, %v1586_v3  ;;  %v299_v34 = vmul.f32 0.0078125, %v246_v7  ;;  %v361_v9 = vmul.f32 %v1589_v4, %v1589_v4 }
  0xd6   : > { %v1596_v35 = vsub.f32 %v1460_v10, %v298_v32  ;;  %398 = vadd.xlane.f32.xlu1 %v359_v5  ;;  %400 = vadd.xlane.f32.xlu0 %v360_v33  ;;  %v1599_v8 = vsub.f32 %v1463_v11, %v299_v34 }
  0xd7   : > { %v248_v38 = vpop.xlane.xlu0 %247  ;;  %v250_v39 = vpop.xlane.xlu1 %249 }
  0xd8   : > { %v300_v40 = vmul.f32 0.0078125, %v248_v38  ;;  %v362_v41 = vmul.f32 %v1596_v35, %v1596_v35  ;;  %v301_v42 = vmul.f32 0.0078125, %v250_v39  ;;  %v363_v11 = vmul.f32 %v1599_v8, %v1599_v8 }
  0xda   : > { %v1606_v45 = vsub.f32 %v1468_v12, %v300_v40  ;;  %402 = vadd.xlane.f32.xlu1 %v361_v9  ;;  %404 = vadd.xlane.f32.xlu0 %v362_v41  ;;  %v1609_v10 = vsub.f32 %v1471_v13, %v301_v42 }
  0xdb   : > { %v252_v46 = vpop.xlane.xlu0 %251  ;;  %v254_v47 = vpop.xlane.xlu1 %253 }
  0xdc   : > { %v302_v48 = vmul.f32 0.0078125, %v252_v46  ;;  %v364_v49 = vmul.f32 %v1606_v45, %v1606_v45  ;;  %v303_v50 = vmul.f32 0.0078125, %v254_v47  ;;  %v365_v13 = vmul.f32 %v1609_v10, %v1609_v10 }
  0xde   : > { %v1616_v53 = vsub.f32 %v1476_v14, %v302_v48  ;;  %406 = vadd.xlane.f32.xlu1 %v363_v11  ;;  %408 = vadd.xlane.f32.xlu0 %v364_v49  ;;  %v1619_v12 = vsub.f32 %v1479_v15, %v303_v50 }
  0xdf   : > { %v256_v54 = vpop.xlane.xlu0 %255  ;;  %v258_v55 = vpop.xlane.xlu1 %257 }
  0xe0   : > { %v304_v56 = vmul.f32 0.0078125, %v256_v54  ;;  %v366_v57 = vmul.f32 %v1616_v53, %v1616_v53  ;;  %v305_v58 = vmul.f32 0.0078125, %v258_v55  ;;  %v367_v15 = vmul.f32 %v1619_v12, %v1619_v12 }
  0xe2   : > { %v1626_v61 = vsub.f32 %v1484_v16, %v304_v56  ;;  %410 = vadd.xlane.f32.xlu1 %v365_v13  ;;  %412 = vadd.xlane.f32.xlu0 %v366_v57  ;;  %v1629_v14 = vsub.f32 %v1487_v17, %v305_v58 }
  0xe3   : > { %v260_v62 = vpop.xlane.xlu0 %259  ;;  %v262_v63 = vpop.xlane.xlu1 %261 }
  0xe4   : > { %v306_v0 = vmul.f32 0.0078125, %v260_v62  ;;  %v368_v1 = vmul.f32 %v1626_v61, %v1626_v61  ;;  %v307_v2 = vmul.f32 0.0078125, %v262_v63  ;;  %v369_v17 = vmul.f32 %v1629_v14, %v1629_v14 }
  0xe6   : > { %v1636_v5 = vsub.f32 %v1492_v18, %v306_v0  ;;  %414 = vadd.xlane.f32.xlu1 %v367_v15  ;;  %416 = vadd.xlane.f32.xlu0 %v368_v1  ;;  %v1639_v16 = vsub.f32 %v1495_v19, %v307_v2 }
  0xe7   : > { %v264_v6 = vpop.xlane.xlu0 %263  ;;  %v266_v7 = vpop.xlane.xlu1 %265 }
  0xe8   : > { %v308_v32 = vmul.f32 0.0078125, %v264_v6  ;;  %v370_v33 = vmul.f32 %v1636_v5, %v1636_v5  ;;  %v309_v34 = vmul.f32 0.0078125, %v266_v7  ;;  %v371_v19 = vmul.f32 %v1639_v16, %v1639_v16 }
  0xea   : > { %v1646_v9 = vsub.f32 %v1500_v20, %v308_v32  ;;  %418 = vadd.xlane.f32.xlu1 %v369_v17  ;;  %420 = vadd.xlane.f32.xlu0 %v370_v33  ;;  %v1649_v18 = vsub.f32 %v1503_v21, %v309_v34 }
  0xeb   : > { %v268_v38 = vpop.xlane.xlu0 %267  ;;  %v270_v39 = vpop.xlane.xlu1 %269 }
  0xec   : > { %v310_v40 = vmul.f32 0.0078125, %v268_v38  ;;  %v372_v41 = vmul.f32 %v1646_v9, %v1646_v9  ;;  %v311_v42 = vmul.f32 0.0078125, %v270_v39  ;;  %v373_v21 = vmul.f32 %v1649_v18, %v1649_v18 }
  0xee   : > { %v1656_v11 = vsub.f32 %v1508_v22, %v310_v40  ;;  %422 = vadd.xlane.f32.xlu1 %v371_v19  ;;  %424 = vadd.xlane.f32.xlu0 %v372_v41  ;;  %v1659_v20 = vsub.f32 %v1511_v23, %v311_v42 }
  0xef   : > { %v272_v46 = vpop.xlane.xlu0 %271  ;;  %v274_v47 = vpop.xlane.xlu1 %273 }
  0xf0   : > { %v312_v48 = vmul.f32 0.0078125, %v272_v46  ;;  %v374_v49 = vmul.f32 %v1656_v11, %v1656_v11  ;;  %v313_v50 = vmul.f32 0.0078125, %v274_v47  ;;  %v375_v23 = vmul.f32 %v1659_v20, %v1659_v20 }
  0xf2   : > { %v1666_v13 = vsub.f32 %v1516_v24, %v312_v48  ;;  %426 = vadd.xlane.f32.xlu1 %v373_v21  ;;  %428 = vadd.xlane.f32.xlu0 %v374_v49  ;;  %v1669_v22 = vsub.f32 %v1519_v25, %v313_v50 }
  0xf3   : > { %v276_v54 = vpop.xlane.xlu0 %275  ;;  %v278_v55 = vpop.xlane.xlu1 %277 }
  0xf4   : > { %v314_v56 = vmul.f32 0.0078125, %v276_v54  ;;  %v376_v57 = vmul.f32 %v1666_v13, %v1666_v13  ;;  %v315_v58 = vmul.f32 0.0078125, %v278_v55  ;;  %v377_v25 = vmul.f32 %v1669_v22, %v1669_v22 }
  0xf6   : > { %v1676_v15 = vsub.f32 %v1524_v26, %v314_v56  ;;  %430 = vadd.xlane.f32.xlu1 %v375_v23  ;;  %432 = vadd.xlane.f32.xlu0 %v376_v57  ;;  %v1679_v24 = vsub.f32 %v1527_v27, %v315_v58 }
  0xf7   : > { %v280_v62 = vpop.xlane.xlu0 %279  ;;  %v282_v63 = vpop.xlane.xlu1 %281 }
  0xf8   : > { %v316_v0 = vmul.f32 0.0078125, %v280_v62  ;;  %v378_v1 = vmul.f32 %v1676_v15, %v1676_v15  ;;  %v317_v2 = vmul.f32 0.0078125, %v282_v63  ;;  %v379_v27 = vmul.f32 %v1679_v24, %v1679_v24 }
  0xfa   : > { %v1686_v17 = vsub.f32 %v1532_v28, %v316_v0  ;;  %434 = vadd.xlane.f32.xlu1 %v377_v25  ;;  %436 = vadd.xlane.f32.xlu0 %v378_v1  ;;  %v1689_v26 = vsub.f32 %v1535_v29, %v317_v2 }
  0xfb   : > { %v284_v6 = vpop.xlane.xlu0 %283  ;;  %v286_v7 = vpop.xlane.xlu1 %285 }
  0xfc   : > { %v318_v32 = vmul.f32 0.0078125, %v284_v6  ;;  %v380_v33 = vmul.f32 %v1686_v17, %v1686_v17  ;;  %v319_v34 = vmul.f32 0.0078125, %v286_v7  ;;  %v381_v29 = vmul.f32 %v1689_v26, %v1689_v26 }
  0xfe   : > { %v1696_v19 = vsub.f32 %v1540_v30, %v318_v32  ;;  %438 = vadd.xlane.f32.xlu1 %v379_v27  ;;  %440 = vadd.xlane.f32.xlu0 %v380_v33  ;;  %v1699_v28 = vsub.f32 %v1543_v31, %v319_v34  ;;  %v1710_v32 = vld [vmem:[%s1883_s1] ss:$0 sm:$0xff] }
 0x100   : > { %v382_v38 = vmul.f32 %v1696_v19, %v1696_v19  ;;  %v383_v39 = vmul.f32 %v1699_v28, %v1699_v28 }
 0x102   : > { %442 = vadd.xlane.f32.xlu1 %v381_v29  ;;  %444 = vadd.xlane.f32.xlu0 %v382_v38 }
 0x106   : > { %446 = vadd.xlane.f32.xlu1 %v383_v39 }
 0x14f   : > { %v385_v40 = vpop.xlane.xlu0 %384 }
 0x150   : > { %v448_v30 = vmul.f32 0.0078125, %v385_v40 }
 0x152   : > { %v480_v41 = vadd.f32 1e-05, %v448_v30 }
 0x153   : > { %v387_v42 = vpop.xlane.xlu1 %386  ;;  %v389_v21 = vpop.xlane.xlu0 %388 }
 0x154   : > { %1128 = vrsqrt.f32 %v480_v41  ;;  %v449_v31 = vmul.f32 0.0078125, %v387_v42  ;;  %v450_v46 = vmul.f32 0.0078125, %v389_v21 }
 0x156   : > { %v481_v47 = vadd.f32 1e-05, %v449_v31  ;;  %v482_v48 = vadd.f32 1e-05, %v450_v46  ;;  %v1717_v31 = vld [vmem:[%s1884_s2] ss:$0 sm:$0xff] }
 0x157   : > { %v391_v49 = vpop.xlane.xlu1 %390  ;;  %v393_v50 = vpop.xlane.xlu0 %392 }
 0x158   : > { %1130 = vrsqrt.f32 %v481_v47  ;;  %v451_v23 = vmul.f32 0.0078125, %v391_v49  ;;  %v452_v54 = vmul.f32 0.0078125, %v393_v50 }
 0x159   : > { %1132 = vrsqrt.f32 %v482_v48 }
 0x15a   : > { %v483_v55 = vadd.f32 1e-05, %v451_v23  ;;  %v484_v56 = vadd.f32 1e-05, %v452_v54 }
 0x15b   : > { %v395_v57 = vpop.xlane.xlu1 %394  ;;  %v397_v58 = vpop.xlane.xlu0 %396 }
 0x15c   : > { %1134 = vrsqrt.f32 %v483_v55  ;;  %v453_v25 = vmul.f32 0.0078125, %v395_v57  ;;  %v454_v62 = vmul.f32 0.0078125, %v397_v58 }
 0x15d   : > { %1136 = vrsqrt.f32 %v484_v56 }
 0x15e   : > { %v485_v63 = vadd.f32 1e-05, %v453_v25  ;;  %v486_v0 = vadd.f32 1e-05, %v454_v62 }
 0x15f   : > { %v399_v1 = vpop.xlane.xlu1 %398  ;;  %v401_v2 = vpop.xlane.xlu0 %400 }
 0x160   : > { %1138 = vrsqrt.f32 %v485_v63  ;;  %v455_v27 = vmul.f32 0.0078125, %v399_v1  ;;  %v456_v6 = vmul.f32 0.0078125, %v401_v2 }
 0x161   : > { %v1129_v7 = vpop.eup %1128  ;;  %1140 = vrsqrt.f32 %v486_v0 }
 0x162   : > { %v544_v33 = vmul.f32 %v1129_v7, %v1548_v36  ;;  %v487_v34 = vadd.f32 1e-05, %v455_v27  ;;  %v488_v29 = vadd.f32 1e-05, %v456_v6 }
 0x163   : > { %v403_v38 = vpop.xlane.xlu1 %402  ;;  %v405_v39 = vpop.xlane.xlu0 %404 }
 0x164   : > { %1142 = vrsqrt.f32 %v487_v34  ;;  %v457_v40 = vmul.f32 0.0078125, %v403_v38  ;;  %v458_v30 = vmul.f32 0.0078125, %v405_v39  ;;  %v583_v42 = vmul.f32 %v1710_v32, %v544_v33 }
 0x165   : > { %v1131_v41 = vpop.eup %1130  ;;  %1144 = vrsqrt.f32 %v488_v29 }
 0x166   : > { %v1133_v21 = vpop.eup %1132  ;;  %v545_v36 = vmul.f32 %v1131_v41, %v1556_v43  ;;  %v489_v46 = vadd.f32 1e-05, %v457_v40  ;;  %v490_v47 = vadd.f32 1e-05, %v458_v30  ;;  %v622_v57 = vadd.f32 %v1717_v31, %v583_v42 }
 0x167   : > { %v546_v48 = vmul.f32 %v1133_v21, %v1551_v37  ;;  %v407_v49 = vpop.xlane.xlu1 %406  ;;  %v409_v50 = vpop.xlane.xlu0 %408 }
 0x168   : > { %v584_v23 = vmul.f32 %v1710_v32, %v545_v36  ;;  %1146 = vrsqrt.f32 %v489_v46  ;;  %v459_v54 = vmul.f32 0.0078125, %v407_v49  ;;  %v460_v55 = vmul.f32 0.0078125, %v409_v50 }
 0x169   : > { %v1135_v56 = vpop.eup %1134  ;;  %v585_v58 = vmul.f32 %v1710_v32, %v546_v48  ;;  %1148 = vrsqrt.f32 %v490_v47 }
 0x16a   : > { %v1137_v25 = vpop.eup %1136  ;;  %v623_v43 = vadd.f32 %v1717_v31, %v584_v23  ;;  %v547_v62 = vmul.f32 %v1135_v56, %v1559_v44  ;;  %v491_v37 = vadd.f32 1e-05, %v459_v54  ;;  %v492_v63 = vadd.f32 1e-05, %v460_v55 }
 0x16b   : > { %v548_v0 = vmul.f32 %v1137_v25, %v1566_v51  ;;  %v411_v1 = vpop.xlane.xlu1 %410  ;;  %v413_v2 = vpop.xlane.xlu0 %412  ;;  %v624_v44 = vadd.f32 %v1717_v31, %v585_v58 }
 0x16c   : > { %v986_v27 = vpack.c.bf16 %v623_v43, %v622_v57  ;;  %v586_v6 = vmul.f32 %v1710_v32, %v547_v62  ;;  %1150 = vrsqrt.f32 %v491_v37  ;;  %v461_v7 = vmul.f32 0.0078125, %v411_v1 }
 0x16d   : > { %v1139_v33 = vpop.eup %1138  ;;  %v587_v34 = vmul.f32 %v1710_v32, %v548_v0  ;;  %1152 = vrsqrt.f32 %v492_v63  ;;  %v462_v29 = vmul.f32 0.0078125, %v413_v2 }
 0x16e   : > { %v1141_v38 = vpop.eup %1140  ;;  %987 = vst [vmem:[%s1730_s17] sm:$0xff] %v986_v27   ;;  %v625_v51 = vadd.f32 %v1717_v31, %v586_v6  ;;  %v549_v39 = vmul.f32 %v1139_v33, %v1569_v52  ;;  %v493_v40 = vadd.f32 1e-05, %v461_v7 }
 0x16f   : > { %v550_v30 = vmul.f32 %v1141_v38, %v1576_v59  ;;  %v494_v41 = vadd.f32 1e-05, %v462_v29  ;;  %v415_v42 = vpop.xlane.xlu1 %414  ;;  %v417_v21 = vpop.xlane.xlu0 %416  ;;  %v626_v49 = vadd.f32 %v1717_v31, %v587_v34 }
 0x170   : > { %v991_v36 = vpack.c.bf16 %v625_v51, %v624_v44  ;;  %v588_v46 = vmul.f32 %v1710_v32, %v549_v39  ;;  %1154 = vrsqrt.f32 %v493_v40  ;;  %v463_v47 = vmul.f32 0.0078125, %v415_v42 }
 0x171   : > { %v1143_v48 = vpop.eup %1142  ;;  %1156 = vrsqrt.f32 %v494_v41  ;;  %v464_v50 = vmul.f32 0.0078125, %v417_v21  ;;  %v589_v54 = vmul.f32 %v1710_v32, %v550_v30 }
 0x172   : > { %v1145_v23 = vpop.eup %1144  ;;  %1063 = vst [vmem:[%s1730_s17 + $0x8] sm:$0xff] %v991_v36   ;;  %v627_v52 = vadd.f32 %v1717_v31, %v588_v46  ;;  %v551_v59 = vmul.f32 %v1143_v48, %v1579_v60  ;;  %v495_v55 = vadd.f32 1e-05, %v463_v47 }
 0x173   : > { %v552_v56 = vmul.f32 %v1145_v23, %v1586_v3  ;;  %v496_v57 = vadd.f32 1e-05, %v464_v50  ;;  %v419_v58 = vpop.xlane.xlu1 %418  ;;  %v421_v25 = vpop.xlane.xlu0 %420  ;;  %v628_v60 = vadd.f32 %v1717_v31, %v589_v54 }
 0x174   : > { %v996_v43 = vpack.c.bf16 %v627_v52, %v626_v49  ;;  %v590_v62 = vmul.f32 %v1710_v32, %v551_v59  ;;  %1158 = vrsqrt.f32 %v495_v55  ;;  %v465_v37 = vmul.f32 0.0078125, %v419_v58 }
 0x175   : > { %v1147_v63 = vpop.eup %1146  ;;  %v591_v0 = vmul.f32 %v1710_v32, %v552_v56  ;;  %1160 = vrsqrt.f32 %v496_v57  ;;  %v466_v1 = vmul.f32 0.0078125, %v421_v25 }
 0x176   : > { %v1149_v2 = vpop.eup %1148  ;;  %1064 = vst [vmem:[%s1730_s17 + $0x10] sm:$0xff] %v996_v43   ;;  %v629_v27 = vadd.f32 %v1717_v31, %v590_v62  ;;  %v553_v3 = vmul.f32 %v1147_v63, %v1589_v4  ;;  %v497_v6 = vadd.f32 1e-05, %v465_v37 }
 0x177   : > { %v554_v7 = vmul.f32 %v1149_v2, %v1596_v35  ;;  %v498_v33 = vadd.f32 1e-05, %v466_v1  ;;  %v423_v34 = vpop.xlane.xlu1 %422  ;;  %v425_v29 = vpop.xlane.xlu0 %424  ;;  %v630_v40 = vadd.f32 %v1717_v31, %v591_v0 }
 0x178   : > { %v1001_v38 = vpack.c.bf16 %v629_v27, %v628_v60  ;;  %v592_v44 = vmul.f32 %v1710_v32, %v553_v3  ;;  %1162 = vrsqrt.f32 %v497_v6  ;;  %v467_v51 = vmul.f32 0.0078125, %v423_v34 }
 0x179   : > { %v1151_v39 = vpop.eup %1150  ;;  %1164 = vrsqrt.f32 %v498_v33  ;;  %v468_v30 = vmul.f32 0.0078125, %v425_v29  ;;  %v593_v42 = vmul.f32 %v1710_v32, %v554_v7 }
 0x17a   : > { %v1153_v41 = vpop.eup %1152  ;;  %1065 = vst [vmem:[%s1730_s17 + $0x18] sm:$0xff] %v1001_v38   ;;  %v631_v4 = vadd.f32 %v1717_v31, %v592_v44  ;;  %v555_v35 = vmul.f32 %v1151_v39, %v1599_v8  ;;  %v499_v21 = vadd.f32 1e-05, %v467_v51 }
 0x17b   : > { %v556_v36 = vmul.f32 %v1153_v41, %v1606_v45  ;;  %v500_v46 = vadd.f32 1e-05, %v468_v30  ;;  %v427_v47 = vpop.xlane.xlu1 %426  ;;  %v429_v48 = vpop.xlane.xlu0 %428  ;;  %v632_v8 = vadd.f32 %v1717_v31, %v593_v42 }
 0x17c   : > { %v1006_v49 = vpack.c.bf16 %v631_v4, %v630_v40  ;;  %v594_v50 = vmul.f32 %v1710_v32, %v555_v35  ;;  %1166 = vrsqrt.f32 %v499_v21  ;;  %v469_v23 = vmul.f32 0.0078125, %v427_v47 }
 0x17d   : > { %v1155_v52 = vpop.eup %1154  ;;  %v595_v54 = vmul.f32 %v1710_v32, %v556_v36  ;;  %1168 = vrsqrt.f32 %v500_v46  ;;  %v470_v59 = vmul.f32 0.0078125, %v429_v48 }
 0x17e   : > { %v1157_v55 = vpop.eup %1156  ;;  %1066 = vst [vmem:[%s1730_s17 + $0x20] sm:$0xff] %v1006_v49   ;;  %v633_v56 = vadd.f32 %v1717_v31, %v594_v50  ;;  %v557_v45 = vmul.f32 %v1155_v52, %v1609_v10  ;;  %v501_v57 = vadd.f32 1e-05, %v469_v23 }
 0x17f   : > { %v558_v58 = vmul.f32 %v1157_v55, %v1616_v53  ;;  %v502_v25 = vadd.f32 1e-05, %v470_v59  ;;  %v431_v43 = vpop.xlane.xlu1 %430  ;;  %v433_v62 = vpop.xlane.xlu0 %432  ;;  %v634_v2 = vadd.f32 %v1717_v31, %v595_v54 }
 0x180   : > { %v1011_v37 = vpack.c.bf16 %v633_v56, %v632_v8  ;;  %v596_v63 = vmul.f32 %v1710_v32, %v557_v45  ;;  %1170 = vrsqrt.f32 %v501_v57  ;;  %v471_v0 = vmul.f32 0.0078125, %v431_v43 }
 0x181   : > { %v1159_v1 = vpop.eup %1158  ;;  %1172 = vrsqrt.f32 %v502_v25  ;;  %v472_v60 = vmul.f32 0.0078125, %v433_v62  ;;  %v597_v3 = vmul.f32 %v1710_v32, %v558_v58 }
 0x182   : > { %v1161_v27 = vpop.eup %1160  ;;  %1067 = vst [vmem:[%s1730_s17 + $0x28] sm:$0xff] %v1011_v37   ;;  %v635_v10 = vadd.f32 %v1717_v31, %v596_v63  ;;  %v559_v53 = vmul.f32 %v1159_v1, %v1619_v12  ;;  %v503_v6 = vadd.f32 1e-05, %v471_v0 }
 0x183   : > { %v560_v7 = vmul.f32 %v1161_v27, %v1626_v61  ;;  %v504_v33 = vadd.f32 1e-05, %v472_v60  ;;  %v435_v34 = vpop.xlane.xlu1 %434  ;;  %v437_v29 = vpop.xlane.xlu0 %436  ;;  %v636_v12 = vadd.f32 %v1717_v31, %v597_v3 }
 0x184   : > { %v1016_v38 = vpack.c.bf16 %v635_v10, %v634_v2  ;;  %v598_v44 = vmul.f32 %v1710_v32, %v559_v53  ;;  %1174 = vrsqrt.f32 %v503_v6  ;;  %v473_v51 = vmul.f32 0.0078125, %v435_v34 }
 0x185   : > { %v1163_v39 = vpop.eup %1162  ;;  %v599_v40 = vmul.f32 %v1710_v32, %v560_v7  ;;  %1176 = vrsqrt.f32 %v504_v33  ;;  %v474_v30 = vmul.f32 0.0078125, %v437_v29 }
 0x186   : > { %v1165_v41 = vpop.eup %1164  ;;  %1068 = vst [vmem:[%s1730_s17 + $0x30] sm:$0xff] %v1016_v38   ;;  %v637_v4 = vadd.f32 %v1717_v31, %v598_v44  ;;  %v561_v61 = vmul.f32 %v1163_v39, %v1629_v14  ;;  %v505_v42 = vadd.f32 1e-05, %v473_v51 }
 0x187   : > { %v562_v35 = vmul.f32 %v1165_v41, %v1636_v5  ;;  %v506_v21 = vadd.f32 1e-05, %v474_v30  ;;  %v439_v36 = vpop.xlane.xlu1 %438  ;;  %v441_v46 = vpop.xlane.xlu0 %440  ;;  %v638_v23 = vadd.f32 %v1717_v31, %v599_v40 }
 0x188   : > { %v1021_v47 = vpack.c.bf16 %v637_v4, %v636_v12  ;;  %v600_v48 = vmul.f32 %v1710_v32, %v561_v61  ;;  %1178 = vrsqrt.f32 %v505_v42  ;;  %v475_v49 = vmul.f32 0.0078125, %v439_v36 }
 0x189   : > { %v1167_v50 = vpop.eup %1166  ;;  %1180 = vrsqrt.f32 %v506_v21  ;;  %v476_v52 = vmul.f32 0.0078125, %v441_v46  ;;  %v601_v59 = vmul.f32 %v1710_v32, %v562_v35 }
 0x18a   : > { %v1169_v54 = vpop.eup %1168  ;;  %1069 = vst [vmem:[%s1730_s17 + $0x38] sm:$0xff] %v1021_v47   ;;  %v639_v14 = vadd.f32 %v1717_v31, %v600_v48  ;;  %v563_v5 = vmul.f32 %v1167_v50, %v1639_v16  ;;  %v507_v55 = vadd.f32 1e-05, %v475_v49 }
 0x18b   : > { %v564_v8 = vmul.f32 %v1169_v54, %v1646_v9  ;;  %v508_v56 = vadd.f32 1e-05, %v476_v52  ;;  %v443_v45 = vpop.xlane.xlu1 %442  ;;  %v445_v57 = vpop.xlane.xlu0 %444  ;;  %v640_v16 = vadd.f32 %v1717_v31, %v601_v59 }
 0x18c   : > { %v1026_v58 = vpack.c.bf16 %v639_v14, %v638_v23  ;;  %v602_v25 = vmul.f32 %v1710_v32, %v563_v5  ;;  %1182 = vrsqrt.f32 %v507_v55  ;;  %v477_v43 = vmul.f32 0.0078125, %v443_v45 }
 0x18d   : > { %v1171_v62 = vpop.eup %1170  ;;  %v603_v37 = vmul.f32 %v1710_v32, %v564_v8  ;;  %1184 = vrsqrt.f32 %v508_v56  ;;  %v478_v63 = vmul.f32 0.0078125, %v445_v57 }
 0x18e   : > { %v1173_v0 = vpop.eup %1172  ;;  %1070 = vst [vmem:[%s1730_s17 + $0x40] sm:$0xff] %v1026_v58   ;;  %v641_v9 = vadd.f32 %v1717_v31, %v602_v25  ;;  %v565_v1 = vmul.f32 %v1171_v62, %v1649_v18  ;;  %v509_v2 = vadd.f32 1e-05, %v477_v43 }
 0x18f   : > { %v566_v60 = vmul.f32 %v1173_v0, %v1656_v11  ;;  %v510_v27 = vadd.f32 1e-05, %v478_v63  ;;  %v447_v10 = vpop.xlane.xlu1 %446  ;;  %v642_v33 = vadd.f32 %v1717_v31, %v603_v37 }
 0x190   : > { %v1031_v3 = vpack.c.bf16 %v641_v9, %v640_v16  ;;  %v604_v53 = vmul.f32 %v1710_v32, %v565_v1  ;;  %1186 = vrsqrt.f32 %v509_v2  ;;  %v479_v6 = vmul.f32 0.0078125, %v447_v10 }
 0x191   : > { %v1175_v7 = vpop.eup %1174  ;;  %1188 = vrsqrt.f32 %v510_v27  ;;  %v605_v18 = vmul.f32 %v1710_v32, %v566_v60 }
 0x192   : > { %v1177_v34 = vpop.eup %1176  ;;  %1071 = vst [vmem:[%s1730_s17 + $0x48] sm:$0xff] %v1031_v3   ;;  %v643_v29 = vadd.f32 %v1717_v31, %v604_v53  ;;  %v567_v11 = vmul.f32 %v1175_v7, %v1659_v20  ;;  %v511_v38 = vadd.f32 1e-05, %v479_v6 }
 0x193   : > { %v568_v44 = vmul.f32 %v1177_v34, %v1666_v13  ;;  %v644_v41 = vadd.f32 %v1717_v31, %v605_v18 }
 0x194   : > { %v1036_v51 = vpack.c.bf16 %v643_v29, %v642_v33  ;;  %v606_v39 = vmul.f32 %v1710_v32, %v567_v11  ;;  %1190 = vrsqrt.f32 %v511_v38 }
 0x195   : > { %v1179_v40 = vpop.eup %1178  ;;  %v607_v4 = vmul.f32 %v1710_v32, %v568_v44 }
 0x196   : > { %v1181_v30 = vpop.eup %1180  ;;  %1072 = vst [vmem:[%s1730_s17 + $0x50] sm:$0xff] %v1036_v51   ;;  %v645_v12 = vadd.f32 %v1717_v31, %v606_v39  ;;  %v569_v61 = vmul.f32 %v1179_v40, %v1669_v22 }
 0x197   : > { %v570_v20 = vmul.f32 %v1181_v30, %v1676_v15  ;;  %v646_v36 = vadd.f32 %v1717_v31, %v607_v4 }
 0x198   : > { %v1041_v13 = vpack.c.bf16 %v645_v12, %v644_v41  ;;  %v608_v42 = vmul.f32 %v1710_v32, %v569_v61 }
 0x199   : > { %v1183_v35 = vpop.eup %1182  ;;  %v609_v47 = vmul.f32 %v1710_v32, %v570_v20 }
 0x19a   : > { %v1185_v21 = vpop.eup %1184  ;;  %1073 = vst [vmem:[%s1730_s17 + $0x58] sm:$0xff] %v1041_v13   ;;  %v647_v46 = vadd.f32 %v1717_v31, %v608_v42  ;;  %v571_v48 = vmul.f32 %v1183_v35, %v1679_v24 }
 0x19b   : > { %v572_v22 = vmul.f32 %v1185_v21, %v1686_v17  ;;  %v648_v52 = vadd.f32 %v1717_v31, %v609_v47 }
 0x19c   : > { %v1046_v49 = vpack.c.bf16 %v647_v46, %v646_v36  ;;  %v610_v15 = vmul.f32 %v1710_v32, %v571_v48 }
 0x19d   : > { %v1187_v50 = vpop.eup %1186  ;;  %v611_v14 = vmul.f32 %v1710_v32, %v572_v22 }
 0x19e   : > { %v1189_v23 = vpop.eup %1188  ;;  %1074 = vst [vmem:[%s1730_s17 + $0x60] sm:$0xff] %v1046_v49   ;;  %v649_v54 = vadd.f32 %v1717_v31, %v610_v15  ;;  %v573_v59 = vmul.f32 %v1187_v50, %v1689_v26 }
 0x19f   : > { %v574_v24 = vmul.f32 %v1189_v23, %v1696_v19  ;;  %v650_v8 = vadd.f32 %v1717_v31, %v611_v14 }
 0x1a0   : > { %v1051_v17 = vpack.c.bf16 %v649_v54, %v648_v52  ;;  %v612_v5 = vmul.f32 %v1710_v32, %v573_v59 }
 0x1a1   : > { %v1191_v55 = vpop.eup %1190  ;;  %v613_v45 = vmul.f32 %v1710_v32, %v574_v24 }
 0x1a2   : > { %1075 = vst [vmem:[%s1730_s17 + $0x68] sm:$0xff] %v1051_v17   ;;  %v651_v56 = vadd.f32 %v1717_v31, %v612_v5  ;;  %v575_v57 = vmul.f32 %v1191_v55, %v1699_v28 }
 0x1a3   : > { %v652_v19 = vadd.f32 %v1717_v31, %v613_v45 }
 0x1a4   : > { %v1056_v58 = vpack.c.bf16 %v651_v56, %v650_v8  ;;  %v614_v26 = vmul.f32 %v1710_v32, %v575_v57 }
 0x1a6   : > { %1076 = vst [vmem:[%s1730_s17 + $0x70] sm:$0xff] %v1056_v58   ;;  %v653_v25 = vadd.f32 %v1717_v31, %v614_v26 }
 0x1a8   : > { %v1061_v28 = vpack.c.bf16 %v653_v25, %v652_v19 }
 0x1aa   : > { %1077 = vst [vmem:[%s1730_s17 + $0x78] sm:$0xff] %v1061_v28  }
 0x1ab   : > { %1233 = shalt.err (!%p1230_p10)
}
 0x1ac   : > { %s1234_s10 = scalar_lea.hbm %s1836_s27, 2048  ;;  %s1238_s4 = scalar_lea.hbm %s1885_s3, 4096 }
 0x1ad   : > { %p1235_p0 = scmp.ne.s32.totalorder %s1836_s27, %s1234_s10  ;;  %p1239_p1 = scmp.lt.s32.totalorder %s1836_s27, %s1885_s3 }
 0x1ae   : > { %p1240_p3 = scmp.lt.s32.totalorder %s1238_s4, %s1234_s10 }
 0x1af   : > { %p1236_p2 = pnand %p1235_p0, %p1894_p12 }
 0x1b0   : > { %p1241_p6 = por %p1240_p3, %p1239_p1 }
 0x1b1   : > { %p1237_p9 = pneg %p1236_p2 }
 0x1b3   : > { %p1242_p11 = pnand %p1241_p6, %p1237_p9 }
 0x1b5   : > { %1245 = shalt.err (!%p1242_p11)
}
 0x1b6   : > { %s1290_s8 = smov 64   ;;  %s1291_s17 = smov 4  }
 0x1b7   : > { %1080 = dma.vmem_to_hbm [thread:$0]  (%p1894_p12), %s1838_s20, 2048, %s1836_s27, %s815_s28, %s1290_s8, %s1290_s8, %s1291_s17  }
 0x1b8 PF: > { %s843_s19 = sand.u32 1, %s1272_s12   ;;  %p1895_p13 = scmp.ne.s32.totalorder %s1891_s25, 0 }
 0x1b9   : > { %p1896_p4 = scmp.ge.s32.totalorder %s1284_s15, 2  ;;  %s844_s22 = scalar_lea.sflag [#allocation4], %s843_s19 }
 0x1bb   : > { %p1087_p5 = pnand %p1896_p4, %p1895_p13 }
 0x1bd   : > { %p1088_p7 = pneg %p1087_p5 }
 0x1bf   : > { %1267 = dma.done.wait (%p1088_p7), %s844_s22, 2048  }
 0x1c0   : > { %1269 = vsyncadd (%p1088_p7), %s844_s22, 4294965248  ;;  %p16_p8 = scmp.ge.s32.totalorder %s1337_s18, 4   ;;  %s1897_s12 = smov %s1276_s13 }
 0x1c1   : > { %s1898_s13 = smov %s1280_s14  ;;  %s1899_s14 = smov %s1349_s21 }
 0x1c2   : > { %s1900_s15 = smov %s1337_s18  ;;  %18 = sbr.rel (!%p16_p8) target bundleno = 5 (0x5), region = 77 }
 0x1c7   :  { %849 = vsyncpa [#allocation3], 1 }
 0x1c8   :  { %851 = vsyncpa [#allocation3 + $0x1], 1 }
 0x1c9   :  { %852 = vsyncpa [#allocation4], 1 }
 0x1ca   :  { %854 = vsyncpa [#allocation4 + $0x1], 1 }

</bundles_post_ra>
